<compile_context>
chip_gen: v6e
topology: v6e:2x2x1
jax: 0.10.0
libtpu: 0.0.40
codegen_flags: <defaults>
</compile_context>

<pallas_src>
import jax
import jax.numpy as jnp
from jax.experimental import pallas as pl
from jax.experimental.pallas import tpu as pltpu

# ---- problem sizes (small, consistent with the module: d = d_model/H = 1) ----
B = 2          # batch
S = 8          # sequence length
NUM_HEADS = 4  # heads
D_HEAD = 1     # d_model // num_heads  (outer-add view semantics require d == 1)
D_MODEL = NUM_HEADS * D_HEAD  # = 4

# The Q-elision (softmax shift-invariance) and the packed-weight layout are
# only valid for additive 'OA' scoring with per-head dim 1 -- guard it.
assert D_HEAD == 1, "FOAA_SA 'OA' kernel requires d_model // num_heads == 1"


def foaa_sa_kernel(x_ref, p_ref, o_ref):
    """Single invocation: whole problem (<1 KB) lives in one VMEM tile each."""
    x = x_ref[...]                                   # (B*S, D_MODEL) = (16, 4)
    p = p_ref[...]                                   # (5, 12) packed params

    # Static slices of the packed params (all within one (8,128) vreg tile).
    wkv = p[0:D_MODEL, 0:2 * D_MODEL]                # (4, 8)  [Wk.T/sqrt(d) | Wv.T]
    bkv = p[D_MODEL:D_MODEL + 1, 0:2 * D_MODEL]      # (1, 8)  [bk/sqrt(d)  | bv  ]
    wm = p[0:D_MODEL, 2 * D_MODEL:3 * D_MODEL]       # (4, 4)  Wm.T
    bm = p[D_MODEL:D_MODEL + 1, 2 * D_MODEL:3 * D_MODEL]  # (1, 4) bm

    # Fused K/V projection as unrolled VPU broadcast-FMAs (K = 4); avoids the
    # MXU fill + result-pop latency of a near-empty (16,4)x(4,8) matmul.
    kv = jnp.broadcast_to(bkv, (B * S, 2 * D_MODEL))
    for k in range(D_MODEL):
        kv = kv + x[:, k:k + 1] * wkv[k:k + 1, :]    # (16, 8)

    out_rows = []
    for b in range(B):                               # static unroll, B is tiny
        kv_b = kv[b * S:(b + 1) * S, :]              # (S, 2*D_MODEL)
        k_b = kv_b[:, :D_MODEL]                      # (S, H)  scale pre-folded
        v_b = kv_b[:, D_MODEL:]                      # (S, H)

        # Softmax over the key axis; weights are query-independent (Q elided).
        k_b = k_b - jnp.max(k_b, axis=0, keepdims=True)
        e = jnp.exp(k_b)
        denom = jnp.sum(e, axis=0, keepdims=True)    # (1, H)
        num = jnp.sum(e * v_b, axis=0, keepdims=True)  # (1, H)
        # Exact reciprocal: approx=True would risk the 1e-5 accuracy check.
        ctx_b = num * pl.reciprocal(denom, approx=False)  # (1, H)

        # Output projection as unrolled VPU FMAs (K = 4), done per batch so no
        # ctx concatenation is ever materialized.
        proj_b = bm
        for k in range(D_MODEL):
            proj_b = proj_b + ctx_b[:, k:k + 1] * wm[k:k + 1, :]   # (1, D_MODEL)

        out_rows.append(jnp.broadcast_to(proj_b, (S, D_MODEL)))

    # Assemble the full (B*S, D_MODEL) slab in vregs and issue ONE store.
    o_ref[...] = jnp.concatenate(out_rows, axis=0).astype(o_ref.dtype)


@jax.jit
def foaa_sa(x, wq, bq, wk, bk, wv, bv, wm, bm):
    # wq/bq are accepted for interface parity with the PyTorch module but are
    # dead code: softmax shift-invariance makes the weights Q-independent.
    del wq, bq

    # Trace-time weight prep (free inside the jit):
    #   * fold 1/sqrt(D_HEAD) into the K weights/bias (no in-kernel scale op),
    #   * fuse K/V and pre-transpose so the kernel never relayouts,
    #   * pack everything into ONE (5, 12) params array -> single input DMA.
    scale = 1.0 / jnp.sqrt(jnp.float32(D_HEAD))
    top = jnp.concatenate([wk.T * scale, wv.T, wm.T], axis=1)   # (4, 3*D_MODEL)
    bot = jnp.concatenate([bk * scale, bv, bm], axis=1)         # (1, 3*D_MODEL)
    params = jnp.concatenate([top, bot], axis=0)                # (5, 3*D_MODEL)

    x2d = x.reshape(B * S, D_MODEL)

    out2d = pl.pallas_call(
        foaa_sa_kernel,
        out_shape=jax.ShapeDtypeStruct((B * S, D_MODEL), jnp.float32),
        # Gridless call: whole arrays in VMEM, no grid-loop/pipeline overhead.
        in_specs=[
            pl.BlockSpec(memory_space=pltpu.MemorySpace.VMEM),  # x
            pl.BlockSpec(memory_space=pltpu.MemorySpace.VMEM),  # packed params
        ],
        out_specs=pl.BlockSpec(memory_space=pltpu.MemorySpace.VMEM),
    )(x2d, params)

    return out2d.reshape(B, S, D_MODEL)


def reference(x, wq, bq, wk, bk, wv, bv, wm, bm):
    """Pure-JAX mirror of the full PyTorch forward (Q included, per-head loop)."""
    q = x @ wq.T + bq
    k = x @ wk.T + bk
    v = x @ wv.T + bv
    outs = []
    for h in range(NUM_HEADS):
        qh = q[:, :, h * D_HEAD:(h + 1) * D_HEAD]          # (B,S,1)
        kh = k[:, :, h * D_HEAD:(h + 1) * D_HEAD]          # (B,S,1)
        vh = v[:, :, h * D_HEAD:(h + 1) * D_HEAD]          # (B,S,1)
        scores = (qh + jnp.swapaxes(kh, 1, 2)) / jnp.sqrt(jnp.float32(D_HEAD))
        attn = jax.nn.softmax(scores, axis=-1)
        outs.append(attn @ vh)
    out = jnp.concatenate(outs, axis=-1)
    return out @ wm.T + bm


def init_params(key):
    """Deterministic PyTorch-Linear-style init: U(-1/sqrt(fan_in), 1/sqrt(fan_in))."""
    bound = 1.0 / jnp.sqrt(jnp.float32(D_MODEL))
    keys = jax.random.split(key, 8)
    u = lambda k, shp: jax.random.uniform(k, shp, jnp.float32, -bound, bound)
    wq = u(keys[0], (D_MODEL, D_MODEL))   # per-head (d, d_model) weights stacked on axis 0
    bq = u(keys[1], (1, D_MODEL))
    wk = u(keys[2], (D_MODEL, D_MODEL))
    bk = u(keys[3], (1, D_MODEL))
    wv = u(keys[4], (D_MODEL, D_MODEL))
    bv = u(keys[5], (1, D_MODEL))
    wm = u(keys[6], (D_MODEL, D_MODEL))
    bm = u(keys[7], (1, D_MODEL))
    return wq, bq, wk, bk, wv, bv, wm, bm


if __name__ == "__main__":
    key = jax.random.PRNGKey(0)
    kx, kp = jax.random.split(key)
    x = jax.random.normal(kx, (B, S, D_MODEL), jnp.float32)
    params = init_params(kp)

    out = foaa_sa(x, *params)
    out = jax.block_until_ready(out)

    ref = reference(x, *params)
    assert out.shape == (B, S, D_MODEL)
    assert jnp.allclose(out, ref, atol=1e-5, rtol=1e-5), "mismatch vs JAX reference"

    print("KERNEL_OK")
</pallas_src>

<mosaic_0001>
module attributes {stable_mosaic.version = 11 : i64} {
  func.func @foaa_sa_kernel(%arg0: memref<16x4xf32, #tpu.memory_space<vmem>>, %arg1: memref<5x12xf32, #tpu.memory_space<vmem>>, %arg2: memref<16x4xf32, #tpu.memory_space<vmem>>) attributes {dimension_semantics = [], scalar_prefetch = 0 : i64, scratch_operands = 0 : i64, tpu.core_type = #tpu.core_type<tc>} {
    %c0 = arith.constant 0 : index
    %c0_0 = arith.constant 0 : index
    %0 = vector.load %arg0[%c0, %c0_0] : memref<16x4xf32, #tpu.memory_space<vmem>>, vector<16x4xf32>
    %c0_1 = arith.constant 0 : index
    %c0_2 = arith.constant 0 : index
    %1 = vector.load %arg1[%c0_1, %c0_2] : memref<5x12xf32, #tpu.memory_space<vmem>>, vector<5x12xf32>
    %2 = vector.extract_strided_slice %1 {offsets = [0, 0], sizes = [4, 8], strides = [1, 1]} : vector<5x12xf32> to vector<4x8xf32>
    %3 = vector.extract_strided_slice %1 {offsets = [4, 0], sizes = [1, 8], strides = [1, 1]} : vector<5x12xf32> to vector<1x8xf32>
    %4 = vector.extract_strided_slice %1 {offsets = [0, 8], sizes = [4, 4], strides = [1, 1]} : vector<5x12xf32> to vector<4x4xf32>
    %5 = vector.extract_strided_slice %1 {offsets = [4, 8], sizes = [1, 4], strides = [1, 1]} : vector<5x12xf32> to vector<1x4xf32>
    %6 = vector.shape_cast %3 : vector<1x8xf32> to vector<1x8xf32>
    %7 = vector.broadcast %6 : vector<1x8xf32> to vector<16x8xf32>
    %8 = vector.extract_strided_slice %0 {offsets = [0, 0], sizes = [16, 1], strides = [1, 1]} : vector<16x4xf32> to vector<16x1xf32>
    %9 = vector.extract_strided_slice %2 {offsets = [0, 0], sizes = [1, 8], strides = [1, 1]} : vector<4x8xf32> to vector<1x8xf32>
    %10 = vector.broadcast %8 : vector<16x1xf32> to vector<16x8xf32>
    %11 = vector.broadcast %9 : vector<1x8xf32> to vector<16x8xf32>
    %12 = arith.mulf %10, %11 : vector<16x8xf32>
    %13 = arith.addf %7, %12 : vector<16x8xf32>
    %14 = vector.extract_strided_slice %0 {offsets = [0, 1], sizes = [16, 1], strides = [1, 1]} : vector<16x4xf32> to vector<16x1xf32>
    %15 = vector.extract_strided_slice %2 {offsets = [1, 0], sizes = [1, 8], strides = [1, 1]} : vector<4x8xf32> to vector<1x8xf32>
    %16 = vector.broadcast %14 : vector<16x1xf32> to vector<16x8xf32>
    %17 = vector.broadcast %15 : vector<1x8xf32> to vector<16x8xf32>
    %18 = arith.mulf %16, %17 : vector<16x8xf32>
    %19 = arith.addf %13, %18 : vector<16x8xf32>
    %20 = vector.extract_strided_slice %0 {offsets = [0, 2], sizes = [16, 1], strides = [1, 1]} : vector<16x4xf32> to vector<16x1xf32>
    %21 = vector.extract_strided_slice %2 {offsets = [2, 0], sizes = [1, 8], strides = [1, 1]} : vector<4x8xf32> to vector<1x8xf32>
    %22 = vector.broadcast %20 : vector<16x1xf32> to vector<16x8xf32>
    %23 = vector.broadcast %21 : vector<1x8xf32> to vector<16x8xf32>
    %24 = arith.mulf %22, %23 : vector<16x8xf32>
    %25 = arith.addf %19, %24 : vector<16x8xf32>
    %26 = vector.extract_strided_slice %0 {offsets = [0, 3], sizes = [16, 1], strides = [1, 1]} : vector<16x4xf32> to vector<16x1xf32>
    %27 = vector.extract_strided_slice %2 {offsets = [3, 0], sizes = [1, 8], strides = [1, 1]} : vector<4x8xf32> to vector<1x8xf32>
    %28 = vector.broadcast %26 : vector<16x1xf32> to vector<16x8xf32>
    %29 = vector.broadcast %27 : vector<1x8xf32> to vector<16x8xf32>
    %30 = arith.mulf %28, %29 : vector<16x8xf32>
    %31 = arith.addf %25, %30 : vector<16x8xf32>
    %32 = vector.extract_strided_slice %31 {offsets = [0, 0], sizes = [8, 8], strides = [1, 1]} : vector<16x8xf32> to vector<8x8xf32>
    %33 = vector.extract_strided_slice %32 {offsets = [0, 0], sizes = [8, 4], strides = [1, 1]} : vector<8x8xf32> to vector<8x4xf32>
    %34 = vector.extract_strided_slice %32 {offsets = [0, 4], sizes = [8, 4], strides = [1, 1]} : vector<8x8xf32> to vector<8x4xf32>
    %cst = arith.constant dense<0xFF800000> : vector<4xf32>
    %35 = vector.multi_reduction <maximumf>, %33, %cst [0] : vector<8x4xf32> to vector<4xf32>
    %36 = vector.shape_cast %35 : vector<4xf32> to vector<1x4xf32>
    %37 = vector.broadcast %36 : vector<1x4xf32> to vector<8x4xf32>
    %38 = arith.subf %33, %37 : vector<8x4xf32>
    %39 = math.exp %38 : vector<8x4xf32>
    %cst_3 = arith.constant dense<0.000000e+00> : vector<4xf32>
    %40 = vector.multi_reduction <add>, %39, %cst_3 [0] : vector<8x4xf32> to vector<4xf32>
    %41 = vector.shape_cast %40 : vector<4xf32> to vector<1x4xf32>
    %42 = arith.mulf %39, %34 : vector<8x4xf32>
    %cst_4 = arith.constant dense<0.000000e+00> : vector<4xf32>
    %43 = vector.multi_reduction <add>, %42, %cst_4 [0] : vector<8x4xf32> to vector<4xf32>
    %44 = vector.shape_cast %43 : vector<4xf32> to vector<1x4xf32>
    %45 = tpu.reciprocal %41 : vector<1x4xf32> -> vector<1x4xf32>
    %46 = arith.mulf %44, %45 : vector<1x4xf32>
    %47 = vector.extract_strided_slice %46 {offsets = [0, 0], sizes = [1, 1], strides = [1, 1]} : vector<1x4xf32> to vector<1x1xf32>
    %48 = vector.extract_strided_slice %4 {offsets = [0, 0], sizes = [1, 4], strides = [1, 1]} : vector<4x4xf32> to vector<1x4xf32>
    %49 = vector.broadcast %47 : vector<1x1xf32> to vector<1x4xf32>
    %50 = arith.mulf %49, %48 : vector<1x4xf32>
    %51 = arith.addf %5, %50 : vector<1x4xf32>
    %52 = vector.extract_strided_slice %46 {offsets = [0, 1], sizes = [1, 1], strides = [1, 1]} : vector<1x4xf32> to vector<1x1xf32>
    %53 = vector.extract_strided_slice %4 {offsets = [1, 0], sizes = [1, 4], strides = [1, 1]} : vector<4x4xf32> to vector<1x4xf32>
    %54 = vector.broadcast %52 : vector<1x1xf32> to vector<1x4xf32>
    %55 = arith.mulf %54, %53 : vector<1x4xf32>
    %56 = arith.addf %51, %55 : vector<1x4xf32>
    %57 = vector.extract_strided_slice %46 {offsets = [0, 2], sizes = [1, 1], strides = [1, 1]} : vector<1x4xf32> to vector<1x1xf32>
    %58 = vector.extract_strided_slice %4 {offsets = [2, 0], sizes = [1, 4], strides = [1, 1]} : vector<4x4xf32> to vector<1x4xf32>
    %59 = vector.broadcast %57 : vector<1x1xf32> to vector<1x4xf32>
    %60 = arith.mulf %59, %58 : vector<1x4xf32>
    %61 = arith.addf %56, %60 : vector<1x4xf32>
    %62 = vector.extract_strided_slice %46 {offsets = [0, 3], sizes = [1, 1], strides = [1, 1]} : vector<1x4xf32> to vector<1x1xf32>
    %63 = vector.extract_strided_slice %4 {offsets = [3, 0], sizes = [1, 4], strides = [1, 1]} : vector<4x4xf32> to vector<1x4xf32>
    %64 = vector.broadcast %62 : vector<1x1xf32> to vector<1x4xf32>
    %65 = arith.mulf %64, %63 : vector<1x4xf32>
    %66 = arith.addf %61, %65 : vector<1x4xf32>
    %67 = vector.shape_cast %66 : vector<1x4xf32> to vector<1x4xf32>
    %68 = vector.broadcast %67 : vector<1x4xf32> to vector<8x4xf32>
    %69 = vector.extract_strided_slice %31 {offsets = [8, 0], sizes = [8, 8], strides = [1, 1]} : vector<16x8xf32> to vector<8x8xf32>
    %70 = vector.extract_strided_slice %69 {offsets = [0, 0], sizes = [8, 4], strides = [1, 1]} : vector<8x8xf32> to vector<8x4xf32>
    %71 = vector.extract_strided_slice %69 {offsets = [0, 4], sizes = [8, 4], strides = [1, 1]} : vector<8x8xf32> to vector<8x4xf32>
    %cst_5 = arith.constant dense<0xFF800000> : vector<4xf32>
    %72 = vector.multi_reduction <maximumf>, %70, %cst_5 [0] : vector<8x4xf32> to vector<4xf32>
    %73 = vector.shape_cast %72 : vector<4xf32> to vector<1x4xf32>
    %74 = vector.broadcast %73 : vector<1x4xf32> to vector<8x4xf32>
    %75 = arith.subf %70, %74 : vector<8x4xf32>
    %76 = math.exp %75 : vector<8x4xf32>
    %cst_6 = arith.constant dense<0.000000e+00> : vector<4xf32>
    %77 = vector.multi_reduction <add>, %76, %cst_6 [0] : vector<8x4xf32> to vector<4xf32>
    %78 = vector.shape_cast %77 : vector<4xf32> to vector<1x4xf32>
    %79 = arith.mulf %76, %71 : vector<8x4xf32>
    %cst_7 = arith.constant dense<0.000000e+00> : vector<4xf32>
    %80 = vector.multi_reduction <add>, %79, %cst_7 [0] : vector<8x4xf32> to vector<4xf32>
    %81 = vector.shape_cast %80 : vector<4xf32> to vector<1x4xf32>
    %82 = tpu.reciprocal %78 : vector<1x4xf32> -> vector<1x4xf32>
    %83 = arith.mulf %81, %82 : vector<1x4xf32>
    %84 = vector.extract_strided_slice %83 {offsets = [0, 0], sizes = [1, 1], strides = [1, 1]} : vector<1x4xf32> to vector<1x1xf32>
    %85 = vector.extract_strided_slice %4 {offsets = [0, 0], sizes = [1, 4], strides = [1, 1]} : vector<4x4xf32> to vector<1x4xf32>
    %86 = vector.broadcast %84 : vector<1x1xf32> to vector<1x4xf32>
    %87 = arith.mulf %86, %85 : vector<1x4xf32>
    %88 = arith.addf %5, %87 : vector<1x4xf32>
    %89 = vector.extract_strided_slice %83 {offsets = [0, 1], sizes = [1, 1], strides = [1, 1]} : vector<1x4xf32> to vector<1x1xf32>
    %90 = vector.extract_strided_slice %4 {offsets = [1, 0], sizes = [1, 4], strides = [1, 1]} : vector<4x4xf32> to vector<1x4xf32>
    %91 = vector.broadcast %89 : vector<1x1xf32> to vector<1x4xf32>
    %92 = arith.mulf %91, %90 : vector<1x4xf32>
    %93 = arith.addf %88, %92 : vector<1x4xf32>
    %94 = vector.extract_strided_slice %83 {offsets = [0, 2], sizes = [1, 1], strides = [1, 1]} : vector<1x4xf32> to vector<1x1xf32>
    %95 = vector.extract_strided_slice %4 {offsets = [2, 0], sizes = [1, 4], strides = [1, 1]} : vector<4x4xf32> to vector<1x4xf32>
    %96 = vector.broadcast %94 : vector<1x1xf32> to vector<1x4xf32>
    %97 = arith.mulf %96, %95 : vector<1x4xf32>
    %98 = arith.addf %93, %97 : vector<1x4xf32>
    %99 = vector.extract_strided_slice %83 {offsets = [0, 3], sizes = [1, 1], strides = [1, 1]} : vector<1x4xf32> to vector<1x1xf32>
    %100 = vector.extract_strided_slice %4 {offsets = [3, 0], sizes = [1, 4], strides = [1, 1]} : vector<4x4xf32> to vector<1x4xf32>
    %101 = vector.broadcast %99 : vector<1x1xf32> to vector<1x4xf32>
    %102 = arith.mulf %101, %100 : vector<1x4xf32>
    %103 = arith.addf %98, %102 : vector<1x4xf32>
    %104 = vector.shape_cast %103 : vector<1x4xf32> to vector<1x4xf32>
    %105 = vector.broadcast %104 : vector<1x4xf32> to vector<8x4xf32>
    %106 = tpu.concatenate %68, %105 in 0 : vector<8x4xf32>, vector<8x4xf32> -> vector<16x4xf32>
    %c0_8 = arith.constant 0 : index
    %c0_9 = arith.constant 0 : index
    %107 = vector.load %arg2[%c0_8, %c0_9] : memref<16x4xf32, #tpu.memory_space<vmem>>, vector<16x4xf32>
    tpu.vector_store %arg2[%c0_8, %c0_9], %106 {strides = array<i32>} : memref<16x4xf32, #tpu.memory_space<vmem>>, vector<16x4xf32>,
    return
  }
}

</mosaic_0001>

<bundles_post_ra>
// kernel: foaa_sa.1
= control target key start
LH: loop header
LB: loop body
LE: loop exit
PB: predicated region body
PF: predicated region fallthrough
CT: control target
= control target key end

     0   :  { %v270_v0 = vmov 1   ;;  %v271_v1 = vmov 0   ;;  %v272_v4 = vmov 2   ;;  %v273_v5 = vmov 3   ;;  %s275_s14 = smov 120   ;;  %s346_s0 = inlined_call_operand.vmem [shape: f32[16,4], index: 0, kind: input, shape index: {}]   ;;  %s347_s1 = inlined_call_operand.vmem [shape: f32[5,12], index: 1, kind: input, shape index: {}]   ;;  %s348_s2 = inlined_call_operand.vmem [shape: f32[16,4], index: 2, kind: output, shape index: {}]  }
   0x1   :  { %250 = vset.pattern.permute.xlu1 %v270_v0  ;;  %249 = vset.pattern.permute.xlu0 %v271_v1  ;;  %v11_v2 = vld [vmem:[%s346_s0] sm:$0xff]  ;;  %v12_v3 = vld [vmem:[%s346_s0 + $0x8] sm:$0xff]  ;;  %v14_v6 = vlaneseq  ;;  %vm84_vm0 = vcmask 31744  }
   0x2   :  { %37 = vperm.xlu1 %250, %v11_v2   ;;  %20 = vperm.xlu0 %249, %v11_v2   ;;  %v305_v9 = vld [vmem:[%s347_s1] sm:$0x1f]  ;;  %s274_s1 = smov 124  }
   0x3   :  { %v15_v7 = vshrl.u32 %v14_v6, 7 }
   0x5   :  { %v30_v8 = vsub.s32 0, %v15_v7  ;;  %v307_v12 = vsub.s32 4, %v15_v7  ;;  %v46_v14 = vsub.s32 1, %v15_v7  ;;  %v62_v15 = vsub.s32 2, %v15_v7 }
   0x6   :  { %41 = vperm.xlu1 %250, %v12_v3   ;;  %25 = vperm.xlu0 %249, %v12_v3   ;;  %v78_v23 = vsub.s32 3, %v15_v7 }
   0x7   :  { %v31_v13 = vrot.slane %v305_v9, %v30_v8  ;;  %v17_v18 = vrot.slane %v305_v9, %v307_v12  ;;  %v47_v20 = vrot.slane %v305_v9, %v46_v14  ;;  %v63_v22 = vrot.slane %v305_v9, %v62_v15 }
   0x8   :  { %v79_v30 = vrot.slane %v305_v9, %v78_v23 }
   0xa   :  { %252 = vset.pattern.permute.xlu1 %v272_v4  ;;  %251 = vset.pattern.permute.xlu0 %v272_v4 }
   0xb   :  { %57 = vperm.xlu1 %252, %v12_v3   ;;  %53 = vperm.xlu0 %251, %v11_v2  }
   0xf   :  { %253 = vset.pattern.permute.xlu1 %v273_v5  ;;  %254 = vset.pattern.permute.xlu0 %v273_v5 }
  0x10   :  { %69 = vperm.xlu1 %253, %v11_v2   ;;  %73 = vperm.xlu0 %254, %v12_v3  }
  0x14   :  { %255 = vset.pattern.permute.xlu0 %v271_v1  ;;  %256 = vset.pattern.permute.xlu1 %v271_v1 }
  0x7d   :  { %v38_v10 = vpop.permute.xlu1 %37  ;;  %v21_v11 = vpop.permute.xlu0 %20 }
  0x7e   :  { %v32_v19 = vmul.f32 %v31_v13, %v21_v11  ;;  %v48_v27 = vmul.f32 %v47_v20, %v38_v10 }
  0x80   :  { %v34_v24 = vadd.f32 %v32_v19, %v17_v18 }
  0x81   :  { %v42_v16 = vpop.permute.xlu1 %41  ;;  %v26_v17 = vpop.permute.xlu0 %25 }
  0x82   :  { %v33_v21 = vmul.f32 %v31_v13, %v26_v17  ;;  %v49_v31 = vmul.f32 %v47_v20, %v42_v16  ;;  %v50_v32 = vadd.f32 %v48_v27, %v34_v24 }
  0x84   :  { %v35_v28 = vadd.f32 %v33_v21, %v17_v18 }
  0x86   :  { %v58_v25 = vpop.permute.xlu1 %57  ;;  %v54_v26 = vpop.permute.xlu0 %53  ;;  %v51_v35 = vadd.f32 %v49_v31, %v35_v28 }
  0x87   :  { %v64_v29 = vmul.f32 %v63_v22, %v54_v26  ;;  %v65_v36 = vmul.f32 %v63_v22, %v58_v25 }
  0x89   :  { %v66_v37 = vadd.f32 %v64_v29, %v50_v32  ;;  %v67_v41 = vadd.f32 %v65_v36, %v51_v35 }
  0x8b   :  { %v70_v33 = vpop.permute.xlu1 %69  ;;  %v74_v34 = vpop.permute.xlu0 %73 }
  0x8c   :  { %v80_v38 = vmul.f32 %v79_v30, %v70_v33  ;;  %v81_v40 = vmul.f32 %v79_v30, %v74_v34 }
  0x8e   :  { %v82_v39 = vadd.f32 %v80_v38, %v66_v37  ;;  %v83_v42 = vadd.f32 %v81_v40, %v67_v41 }
  0x90   :  { %103 = vrot.lane.b32.xlu1 %v82_v39, %s274_s1  ;;  %v85_v43 = vsel %vm84_vm0, %v82_v39, -inf  ;;  %v157_v45 = vsel %vm84_vm0, %v83_v42, -inf }
  0x91   :  { %v86_v44 = vrot.slane %v85_v43, 4  ;;  %v158_v47 = vrot.slane %v157_v45, 4 }
  0x93   :  { %v87_v46 = vmax.f32 %v85_v43, %v86_v44  ;;  %v159_v49 = vmax.f32 %v157_v45, %v158_v47 }
  0x94   :  { %175 = vrot.lane.b32.xlu1 %v83_v42, %s274_s1 }
  0x95   :  { %v88_v48 = vrot.slane %v87_v46, 2  ;;  %v160_v51 = vrot.slane %v159_v49, 2 }
  0x97   :  { %v89_v50 = vmax.f32 %v87_v46, %v88_v48  ;;  %v161_v53 = vmax.f32 %v159_v49, %v160_v51 }
  0x99   :  { %v90_v52 = vrot.slane %v89_v50, 1  ;;  %v162_v55 = vrot.slane %v161_v53, 1 }
  0x9b   :  { %v91_v54 = vmax.f32 %v89_v50, %v90_v52  ;;  %v163_v57 = vmax.f32 %v161_v53, %v162_v55 }
  0x9d   :  { %v92_v56 = vsub.f32 %v82_v39, %v91_v54  ;;  %v164_v59 = vsub.f32 %v83_v42, %v163_v57 }
  0x9f   :  { %v93_v58 = vmul.f32 1.442695, %v92_v56  ;;  %v165_v60 = vmul.f32 1.442695, %v164_v59 }
  0xa1   :  { %262 = vpow2.f32 %v93_v58 }
  0xa2   :  { %264 = vpow2.f32 %v165_v60 }
  0xae   :  { %v263_v61 = vpop.eup %262 }
  0xaf   :  { %v95_v62 = vsel %vm84_vm0, %v263_v61, 0.0  ;;  %v265_v63 = vpop.eup %264 }
  0xb0   :  { %v96_v1 = vrot.slane %v95_v62, 4  ;;  %v167_v2 = vsel %vm84_vm0, %v265_v63, 0.0 }
  0xb1   :  { %v168_v6 = vrot.slane %v167_v2, 4 }
  0xb2   :  { %v97_v3 = vadd.f32 %v96_v1, %v95_v62 }
  0xb3   :  { %v169_v8 = vadd.f32 %v168_v6, %v167_v2 }
  0xb4   :  { %v98_v7 = vrot.slane %v97_v3, 2 }
  0xb5   :  { %v170_v10 = vrot.slane %v169_v8, 2 }
  0xb6   :  { %v99_v11 = vadd.f32 %v98_v7, %v97_v3 }
  0xb7   :  { %v171_v14 = vadd.f32 %v170_v10, %v169_v8 }
  0xb8   :  { %v100_v13 = vrot.slane %v99_v11, 1 }
  0xb9   :  { %v172_v16 = vrot.slane %v171_v14, 1 }
  0xba   :  { %v101_v15 = vadd.f32 %v100_v13, %v99_v11 }
  0xbb   :  { %v173_v19 = vadd.f32 %v172_v16, %v171_v14 }
  0xbc   :  { %266 = vrcp.f32 %v101_v15 }
  0xbd   :  { %268 = vrcp.f32 %v173_v19 }
  0xc9   :  { %v267_v34 = vpop.eup %266 }
  0xca   :  { %v269_v38 = vpop.eup %268 }
 0x102   :  { %v104_v17 = vpop.permute.xlu1 %103 }
 0x103   :  { %v106_v18 = vmul.f32 %v263_v61, %v104_v17 }
 0x105   :  { %v107_v20 = vsel %vm84_vm0, %v106_v18, 0.0 }
 0x106   :  { %v108_v21 = vrot.slane %v107_v20, 4  ;;  %v176_v22 = vpop.permute.xlu1 %175 }
 0x107   :  { %v178_v23 = vmul.f32 %v265_v63, %v176_v22 }
 0x108   :  { %v109_v24 = vadd.f32 %v108_v21, %v107_v20 }
 0x109   :  { %v179_v25 = vsel %vm84_vm0, %v178_v23, 0.0 }
 0x10a   :  { %v110_v26 = vrot.slane %v109_v24, 2  ;;  %v180_v27 = vrot.slane %v179_v25, 4 }
 0x10c   :  { %v111_v28 = vadd.f32 %v110_v26, %v109_v24  ;;  %v181_v29 = vadd.f32 %v180_v27, %v179_v25 }
 0x10e   :  { %v112_v30 = vrot.slane %v111_v28, 1  ;;  %v182_v31 = vrot.slane %v181_v29, 2 }
 0x110   :  { %v113_v32 = vadd.f32 %v112_v30, %v111_v28  ;;  %v183_v33 = vadd.f32 %v182_v31, %v181_v29 }
 0x112   :  { %v184_v35 = vrot.slane %v183_v33, 1  ;;  %v115_v36 = vmul.f32 %v267_v34, %v113_v32 }
 0x114   :  { %v185_v37 = vadd.f32 %v184_v35, %v183_v33  ;;  %118 = vperm.xlu0 %255, %v115_v36  }
 0x116   :  { %v187_v39 = vmul.f32 %v269_v38, %v185_v37 }
 0x118   :  { %258 = vset.pattern.permute.xlu0 %v270_v0  ;;  %190 = vperm.xlu1 %256, %v187_v39  }
 0x119   :  { %199 = vperm.xlu0 %258, %v187_v39  }
 0x11c   :  { %257 = vset.pattern.permute.xlu1 %v270_v0 }
 0x11d   :  { %260 = vset.pattern.permute.xlu0 %v273_v5  ;;  %127 = vperm.xlu1 %257, %v115_v36  }
 0x11e   :  { %145 = vperm.xlu0 %260, %v115_v36  }
 0x121   :  { %259 = vset.pattern.permute.xlu1 %v272_v4 }
 0x122   :  { %136 = vperm.xlu1 %259, %v115_v36  }
 0x126   :  { %208 = vperm.xlu1 %259, %v187_v39  }
 0x12a   :  { %261 = vset.pattern.permute.xlu1 %v273_v5 }
 0x12b   :  { %217 = vperm.xlu1 %261, %v187_v39  }
 0x18f   :  { %v119_v40 = vpop.permute.xlu0 %118 }
 0x190   :  { %v121_v43 = vmul.f32 %v119_v40, %v305_v9 }
 0x192   :  { %v123_v0 = vrot.slane %v121_v43, 4 }
 0x193   :  { %v191_v41 = vpop.permute.xlu1 %190 }
 0x194   :  { %v200_v42 = vpop.permute.xlu0 %199  ;;  %v193_v46 = vmul.f32 %v191_v41, %v305_v9  ;;  %v125_v4 = vadd.f32 %v123_v0, %v305_v9 }
 0x195   :  { %v202_v52 = vmul.f32 %v200_v42, %v305_v9 }
 0x196   :  { %v195_v51 = vrot.slane %v193_v46, 4 }
 0x197   :  { %v204_v60 = vrot.slane %v202_v52, 5 }
 0x198   :  { %v128_v44 = vpop.permute.xlu1 %127  ;;  %v197_v59 = vadd.f32 %v195_v51, %v305_v9 }
 0x199   :  { %v130_v45 = vmul.f32 %v128_v44, %v305_v9  ;;  %v146_v47 = vpop.permute.xlu0 %145 }
 0x19a   :  { %v148_v50 = vmul.f32 %v146_v47, %v305_v9  ;;  %v206_v2 = vadd.f32 %v204_v60, %v197_v59 }
 0x19b   :  { %v132_v48 = vrot.slane %v130_v45, 5 }
 0x19c   :  { %v150_v56 = vrot.slane %v148_v50, 7 }
 0x19d   :  { %v137_v49 = vpop.permute.xlu1 %136  ;;  %v134_v53 = vadd.f32 %v132_v48, %v125_v4 }
 0x19e   :  { %v139_v5 = vmul.f32 %v137_v49, %v305_v9 }
 0x1a0   :  { %v141_v54 = vrot.slane %v139_v5, 6 }
 0x1a1   :  { %v209_v55 = vpop.permute.xlu1 %208 }
 0x1a2   :  { %v143_v57 = vadd.f32 %v141_v54, %v134_v53  ;;  %v211_v58 = vmul.f32 %v209_v55, %v305_v9 }
 0x1a4   :  { %v152_v61 = vadd.f32 %v150_v56, %v143_v57  ;;  %v213_v62 = vrot.slane %v211_v58, 6 }
 0x1a6   :  { %v218_v63 = vpop.permute.xlu1 %217  ;;  %v156_v1 = vrot.slane %v152_v61, %v307_v12  ;;  %v215_v6 = vadd.f32 %v213_v62, %v206_v2 }
 0x1a7   :  { %v220_v3 = vmul.f32 %v218_v63, %v305_v9 }
 0x1a8   :  { %231 = vrot.lane.b32.xlu1 %v156_v1, %s275_s14 }
 0x1a9   :  { %v222_v7 = vrot.slane %v220_v3, 7 }
 0x1ab   :  { %v224_v8 = vadd.f32 %v222_v7, %v215_v6 }
 0x1ad   :  { %v228_v10 = vrot.slane %v224_v8, %v307_v12 }
 0x1af   :  { %233 = vrot.lane.b32.xlu0 %v228_v10, %s275_s14 }
 0x21a   :  { %v232_v11 = vpop.permute.xlu1 %231 }
 0x21b   :  { %237 = vst.msk [vmem:[%s348_s2] sm:$0xff] %vm84_vm0, %v232_v11 }
 0x221   :  { %v234_v13 = vpop.permute.xlu0 %233 }
 0x222   :  { %238 = vst.msk [vmem:[%s348_s2 + $0x8] sm:$0xff] %vm84_vm0, %v234_v13 }

</bundles_post_ra>
